<compile_context>
chip_gen: v7x
topology: tpu7x:2x2x1
jax: 0.10.0
libtpu: 0.0.40
codegen_flags: <defaults>
</compile_context>

<pallas_src>
import functools

import jax
import jax.numpy as jnp
from jax.experimental import pallas as pl
from jax.experimental.pallas import tpu as pltpu


def _reward_mlp_kernel(obs_ref, act_ref, w1o_ref, w1a_ref, b1_ref, w2_ref,
                       b2_ref, out_ref,
                       *, r_min: float, r_scale: float, negative_slope: float):
    """One packed row tile: (obs, act) -> Linear -> LeakyReLU -> Linear(1) -> sigmoid -> scale."""
    # Layer 1: two block-diagonal MXU matmuls over P-row-packed inputs.
    # Inputs stay in their native dtype (f32 or bf16); accumulate in f32.
    h = jnp.dot(obs_ref[...], w1o_ref[...], preferred_element_type=jnp.float32)
    h = h + jnp.dot(act_ref[...], w1a_ref[...], preferred_element_type=jnp.float32)
    h = h + b1_ref[...]                                   # (1, P*H) broadcast
    h = jnp.where(h > 0, h, negative_slope * h)           # LeakyReLU

    # Layer 2: block-diagonal (P*H, P) MXU matmul -> packed per-row scalars
    # (TNp, P); rides the already-hot vex slot instead of an XLU lane reduce.
    z = jnp.dot(h, w2_ref[...], preferred_element_type=jnp.float32) + b2_ref[0]

    r01 = jax.nn.sigmoid(z)                               # in [0, 1]
    out_ref[...] = (r_min + r_scale * r01).astype(out_ref.dtype)


def _largest_pow2_divisor(n: int, cap: int = 8) -> int:
    p = 1
    while p * 2 <= cap and n % (p * 2) == 0:
        p *= 2
    return p


def _round_up(x: int, m: int) -> int:
    return ((x + m - 1) // m) * m


def reward_model_forward(obs, action, params, *, r_min: float, r_max: float,
                         block_rows: int = 4096):
    """Mirrors RewardModel.forward semantics (including the 3-D reshape path)."""
    needs_reshape = obs.ndim == 3
    if needs_reshape:
        B, T = obs.shape[:2]
        assert action.ndim == 3 and action.shape[:2] == (B, T)
        obs = obs.reshape(-1, obs.shape[-1])
        action = action.reshape(-1, action.shape[-1])

    w1, b1, w2, b2 = params
    Do = obs.shape[-1]
    Da = action.shape[-1]
    H = w1.shape[1]
    N = obs.shape[0]
    assert w1.shape[0] == Do + Da

    # bf16 activations stay bf16 into the MXU (halves HBM reads, no in-kernel
    # upcast pass); anything else runs f32 (matches PyTorch default numerics).
    in_dtype = (jnp.bfloat16
                if (obs.dtype == jnp.bfloat16 and action.dtype == jnp.bfloat16)
                else jnp.float32)
    obs = obs.astype(in_dtype)
    action = action.astype(in_dtype)

    # Row packing factor: largest power of two (<= 8) dividing N, so the packed
    # view is a free row-major reshape and NO jnp.pad pass is ever materialized.
    P = _largest_pow2_divisor(N, cap=8)
    Np = N // P
    obs_p = obs.reshape(Np, P * Do)                        # free bitcast reshape
    act_p = action.reshape(Np, P * Da)

    # Block-diagonal weights, built once on the host (tiny arrays).  The
    # obs/action concat is folded into the W1[:Do] / W1[Do:] split; the P-row
    # packing is folded into kron(I_P, .).
    eyeP = jnp.eye(P, dtype=jnp.float32)
    w1f = w1.astype(jnp.float32)
    w1o_bd = jnp.kron(eyeP, w1f[:Do]).astype(in_dtype)     # (P*Do, P*H)
    w1a_bd = jnp.kron(eyeP, w1f[Do:]).astype(in_dtype)     # (P*Da, P*H)
    b1_t = jnp.tile(b1.reshape(1, H).astype(jnp.float32), (1, P))    # (1, P*H)
    w2_bd = jnp.kron(eyeP, w2.reshape(H, 1).astype(jnp.float32))     # (P*H, P)
    b2s = b2.reshape(1).astype(jnp.float32)                # (1,) SMEM scalar

    # Tile selection over *packed* rows.  16-row alignment keeps both f32 (8)
    # and bf16 (16) sublane tiling happy.  No input padding: the grid uses
    # cdiv and Pallas handles the ragged last block (rows are independent and
    # the out-of-range output rows are never read back).
    ROW_ALIGN = 16
    TNp_cap = max(ROW_ALIGN,
                  (max(int(block_rows), P) // P) // ROW_ALIGN * ROW_ALIGN)
    if Np <= TNp_cap:
        if Np >= 2 * ROW_ALIGN:
            # Split into >= 2 tiles so both v7x TensorCores get work.
            TNp = _round_up((Np + 1) // 2, ROW_ALIGN)
        else:
            TNp = Np                                       # full-extent block
    else:
        TNp = TNp_cap
    num_tiles = pl.cdiv(Np, TNp)

    kernel = functools.partial(
        _reward_mlp_kernel,
        r_min=float(r_min),
        r_scale=float(r_max) - float(r_min),
        negative_slope=0.01,                               # PyTorch LeakyReLU default
    )

    out = pl.pallas_call(
        kernel,
        out_shape=jax.ShapeDtypeStruct((Np, P), jnp.float32),
        grid=(num_tiles,),
        in_specs=[
            pl.BlockSpec((TNp, P * Do), lambda i: (i, 0)),      # packed obs tile
            pl.BlockSpec((TNp, P * Da), lambda i: (i, 0)),      # packed action tile
            pl.BlockSpec((P * Do, P * H), lambda i: (0, 0)),    # blkdiag W1[:Do] (resident)
            pl.BlockSpec((P * Da, P * H), lambda i: (0, 0)),    # blkdiag W1[Do:] (resident)
            pl.BlockSpec((1, P * H), lambda i: (0, 0)),         # tiled b1 (resident)
            pl.BlockSpec((P * H, P), lambda i: (0, 0)),         # blkdiag w2 (resident)
            pl.BlockSpec(memory_space=pltpu.MemorySpace.SMEM),  # b2 scalar
        ],
        out_specs=pl.BlockSpec((TNp, P), lambda i: (i, 0)),
        compiler_params=pltpu.CompilerParams(
            dimension_semantics=("parallel",),             # row tiles independent
            vmem_limit_bytes=32 * 1024 * 1024),            # explicit (v5e default is 16 MiB)
    )(obs_p, act_p, w1o_bd, w1a_bd, b1_t, w2_bd, b2s)

    rewards = out.reshape(-1)                              # (N,) — packed order == row order
    if needs_reshape:
        rewards = rewards.reshape(B, T)
    return rewards


def init_params(key, obs_dim: int, action_dim: int, hidden_dim: int):
    """Deterministic synthetic parameters (Linear(D->H), Linear(H->1)), stored as (in, out)."""
    d = obs_dim + action_dim
    k1, k2, k3, k4 = jax.random.split(key, 4)
    w1 = jax.random.normal(k1, (d, hidden_dim), jnp.float32) * (1.0 / jnp.sqrt(d))
    b1 = jax.random.normal(k2, (hidden_dim,), jnp.float32) * 0.01
    w2 = jax.random.normal(k3, (hidden_dim, 1), jnp.float32) * (1.0 / jnp.sqrt(hidden_dim))
    b2 = jax.random.normal(k4, (1,), jnp.float32) * 0.01
    return (w1, b1, w2, b2)


def _reference_forward(obs, action, params, r_min, r_max):
    """Pure-JAX reference for correctness checks."""
    needs_reshape = obs.ndim == 3
    if needs_reshape:
        B, T = obs.shape[:2]
        obs = obs.reshape(-1, obs.shape[-1])
        action = action.reshape(-1, action.shape[-1])
    x = jnp.concatenate([obs, action], axis=-1).astype(jnp.float32)
    w1, b1, w2, b2 = params
    h = x @ w1 + b1.reshape(1, -1)
    h = jnp.where(h > 0, h, 0.01 * h)
    z = h @ w2 + b2.reshape(1, 1)
    r = r_min + (r_max - r_min) * jax.nn.sigmoid(z)
    r = r[:, 0]
    if needs_reshape:
        r = r.reshape(B, T)
    return r


# TODO(synk): compute_reward()/update() (AdamW optimizer, Bradley-Terry loss,
# backward pass) are training-side and not part of this forward kernel.

if __name__ == "__main__":
    obs_dim, action_dim, hidden_dim = 24, 8, 32
    r_min, r_max = -1.0, 1.0

    key = jax.random.PRNGKey(0)
    kp, ko, ka, ko2, ka2, ko3, ka3 = jax.random.split(key, 7)
    params = init_params(kp, obs_dim, action_dim, hidden_dim)

    # --- Test 1: trajectory-shaped (B, T, D) inputs, P=8 packing, single tile. ---
    B, T = 2, 4
    obs3 = jax.random.normal(ko, (B, T, obs_dim), jnp.float32)
    act3 = jax.random.normal(ka, (B, T, action_dim), jnp.float32)
    rewards = reward_model_forward(obs3, act3, params, r_min=r_min, r_max=r_max)
    rewards = jax.block_until_ready(rewards)
    assert rewards.shape == (B, T), rewards.shape
    ref = _reference_forward(obs3, act3, params, r_min, r_max)
    assert jnp.allclose(rewards, ref, atol=1e-5, rtol=1e-5)
    assert bool(jnp.all(rewards >= r_min - 1e-5)) and bool(jnp.all(rewards <= r_max + 1e-5))

    # --- Test 2: 2-D batch, N=300 -> P=4 packing, ragged multi-tile grid (no pad). ---
    N = 300
    obs2 = jax.random.normal(ko2, (N, obs_dim), jnp.float32)
    act2 = jax.random.normal(ka2, (N, action_dim), jnp.float32)
    r2 = reward_model_forward(obs2, act2, params, r_min=r_min, r_max=r_max,
                              block_rows=128)              # grid=(3,), partial last block
    r2 = jax.block_until_ready(r2)
    assert r2.shape == (N,), r2.shape
    ref2 = _reference_forward(obs2, act2, params, r_min, r_max)
    assert jnp.allclose(r2, ref2, atol=1e-5, rtol=1e-5)

    # --- Test 3: bf16 activations go natively into the MXU at half the HBM bytes. ---
    r3 = reward_model_forward(obs2.astype(jnp.bfloat16), act2.astype(jnp.bfloat16),
                              params, r_min=r_min, r_max=r_max, block_rows=128)
    r3 = jax.block_until_ready(r3)
    assert jnp.allclose(r3, ref2, atol=5e-2)

    # --- Test 4: larger batch, default block_rows -> 2 parallel tiles (megacore path). ---
    N4 = 1024
    obs4 = jax.random.normal(ko3, (N4, obs_dim), jnp.float32)
    act4 = jax.random.normal(ka3, (N4, action_dim), jnp.float32)
    r4 = reward_model_forward(obs4, act4, params, r_min=r_min, r_max=r_max)
    r4 = jax.block_until_ready(r4)
    ref4 = _reference_forward(obs4, act4, params, r_min, r_max)
    assert r4.shape == (N4,), r4.shape
    assert jnp.allclose(r4, ref4, atol=1e-5, rtol=1e-5)

    print("KERNEL_OK")
</pallas_src>

<mosaic_0001>
module attributes {stable_mosaic.version = 11 : i64} {
  func.func @_reward_mlp_kernel(%arg0: i32, %arg1: memref<1x192xf32, #tpu.memory_space<vmem>>, %arg2: memref<1x64xf32, #tpu.memory_space<vmem>>, %arg3: memref<192x256xf32, #tpu.memory_space<vmem>>, %arg4: memref<64x256xf32, #tpu.memory_space<vmem>>, %arg5: memref<1x256xf32, #tpu.memory_space<vmem>>, %arg6: memref<256x8xf32, #tpu.memory_space<vmem>>, %arg7: memref<1xf32, #tpu.memory_space<smem>>, %arg8: memref<1x8xf32, #tpu.memory_space<vmem>>) attributes {dimension_semantics = [#tpu.dimension_semantics<parallel>], iteration_bounds = array<i64: 1>, scalar_prefetch = 0 : i64, scratch_operands = 0 : i64, tpu.core_type = #tpu.core_type<tc>, window_params = [{transform_indices = @transform_0, window_bounds = array<i64: 1, 192>}, {transform_indices = @transform_1, window_bounds = array<i64: 1, 64>}, {pipeline_mode = #tpu.pipeline_mode<synchronous>, transform_indices = @transform_2, window_bounds = array<i64: 192, 256>}, {pipeline_mode = #tpu.pipeline_mode<synchronous>, transform_indices = @transform_3, window_bounds = array<i64: 64, 256>}, {pipeline_mode = #tpu.pipeline_mode<synchronous>, transform_indices = @transform_4, window_bounds = array<i64: 1, 256>}, {pipeline_mode = #tpu.pipeline_mode<synchronous>, transform_indices = @transform_5, window_bounds = array<i64: 256, 8>}, {transform_indices = @transform_6, window_bounds = array<i64: 1>}, {transform_indices = @transform_7, window_bounds = array<i64: 1, 8>}]} {
    %c0 = arith.constant 0 : index
    %c0_0 = arith.constant 0 : index
    %0 = vector.load %arg1[%c0, %c0_0] : memref<1x192xf32, #tpu.memory_space<vmem>>, vector<1x192xf32>
    %c0_1 = arith.constant 0 : index
    %c0_2 = arith.constant 0 : index
    %1 = vector.load %arg3[%c0_1, %c0_2] : memref<192x256xf32, #tpu.memory_space<vmem>>, vector<192x256xf32>
    %cst = arith.constant dense<0.000000e+00> : vector<1x256xf32>
    %2 = tpu.matmul %0, %1, %cst {dimension_numbers = #tpu.dot_dimension_numbers<[1], [0], [0], [1], [0, 0, 1, 1], [], []>} : vector<1x192xf32>, vector<192x256xf32>, vector<1x256xf32> -> vector<1x256xf32>
    %c0_3 = arith.constant 0 : index
    %c0_4 = arith.constant 0 : index
    %3 = vector.load %arg2[%c0_3, %c0_4] : memref<1x64xf32, #tpu.memory_space<vmem>>, vector<1x64xf32>
    %c0_5 = arith.constant 0 : index
    %c0_6 = arith.constant 0 : index
    %4 = vector.load %arg4[%c0_5, %c0_6] : memref<64x256xf32, #tpu.memory_space<vmem>>, vector<64x256xf32>
    %cst_7 = arith.constant dense<0.000000e+00> : vector<1x256xf32>
    %5 = tpu.matmul %3, %4, %cst_7 {dimension_numbers = #tpu.dot_dimension_numbers<[1], [0], [0], [1], [0, 0, 1, 1], [], []>} : vector<1x64xf32>, vector<64x256xf32>, vector<1x256xf32> -> vector<1x256xf32>
    %6 = arith.addf %2, %5 : vector<1x256xf32>
    %c0_8 = arith.constant 0 : index
    %c0_9 = arith.constant 0 : index
    %7 = vector.load %arg5[%c0_8, %c0_9] : memref<1x256xf32, #tpu.memory_space<vmem>>, vector<1x256xf32>
    %8 = arith.addf %6, %7 : vector<1x256xf32>
    %cst_10 = arith.constant 0.000000e+00 : f32
    %9 = vector.broadcast %cst_10 : f32 to vector<1x256xf32>
    %10 = arith.cmpf ogt, %8, %9 : vector<1x256xf32>
    %cst_11 = arith.constant 0.00999999977 : f32
    %11 = vector.broadcast %cst_11 : f32 to vector<1x256xf32>
    %12 = arith.mulf %11, %8 : vector<1x256xf32>
    %13 = arith.select %10, %8, %12 : vector<1x256xi1>, vector<1x256xf32>
    %c0_12 = arith.constant 0 : index
    %c0_13 = arith.constant 0 : index
    %14 = vector.load %arg6[%c0_12, %c0_13] : memref<256x8xf32, #tpu.memory_space<vmem>>, vector<256x8xf32>
    %cst_14 = arith.constant dense<0.000000e+00> : vector<1x8xf32>
    %15 = tpu.matmul %13, %14, %cst_14 {dimension_numbers = #tpu.dot_dimension_numbers<[1], [0], [0], [1], [0, 0, 1, 1], [], []>} : vector<1x256xf32>, vector<256x8xf32>, vector<1x8xf32> -> vector<1x8xf32>
    %c0_15 = arith.constant 0 : index
    %16 = memref.load %arg7[%c0_15] : memref<1xf32, #tpu.memory_space<smem>>
    %17 = vector.broadcast %16 : f32 to vector<1x8xf32>
    %18 = arith.addf %15, %17 : vector<1x8xf32>
    %19 = arith.negf %18 : vector<1x8xf32>
    %20 = math.exp %19 : vector<1x8xf32>
    %cst_16 = arith.constant 1.000000e+00 : f32
    %21 = vector.broadcast %cst_16 : f32 to vector<1x8xf32>
    %22 = arith.addf %21, %20 : vector<1x8xf32>
    %23 = arith.divf %21, %22 : vector<1x8xf32>
    %cst_17 = arith.constant 2.000000e+00 : f32
    %24 = vector.broadcast %cst_17 : f32 to vector<1x8xf32>
    %25 = arith.mulf %24, %23 : vector<1x8xf32>
    %cst_18 = arith.constant -1.000000e+00 : f32
    %26 = vector.broadcast %cst_18 : f32 to vector<1x8xf32>
    %27 = arith.addf %26, %25 : vector<1x8xf32>
    %c0_19 = arith.constant 0 : index
    %c0_20 = arith.constant 0 : index
    %28 = vector.load %arg8[%c0_19, %c0_20] : memref<1x8xf32, #tpu.memory_space<vmem>>, vector<1x8xf32>
    tpu.vector_store %arg8[%c0_19, %c0_20], %27 {strides = array<i32>} : memref<1x8xf32, #tpu.memory_space<vmem>>, vector<1x8xf32>,
    return
  }
  func.func @transform_0(%arg0: i32) -> (i32, i32) {
    %c0_i32 = arith.constant 0 : i32
    %c0_i32_0 = arith.constant 0 : i32
    return %arg0, %c0_i32 : i32, i32
  }
  func.func @transform_1(%arg0: i32) -> (i32, i32) {
    %c0_i32 = arith.constant 0 : i32
    %c0_i32_0 = arith.constant 0 : i32
    return %arg0, %c0_i32 : i32, i32
  }
  func.func @transform_2(%arg0: i32) -> (i32, i32) {
    %c0_i32 = arith.constant 0 : i32
    %c0_i32_0 = arith.constant 0 : i32
    %c0_i32_1 = arith.constant 0 : i32
    return %c0_i32, %c0_i32_0 : i32, i32
  }
  func.func @transform_3(%arg0: i32) -> (i32, i32) {
    %c0_i32 = arith.constant 0 : i32
    %c0_i32_0 = arith.constant 0 : i32
    %c0_i32_1 = arith.constant 0 : i32
    return %c0_i32, %c0_i32_0 : i32, i32
  }
  func.func @transform_4(%arg0: i32) -> (i32, i32) {
    %c0_i32 = arith.constant 0 : i32
    %c0_i32_0 = arith.constant 0 : i32
    %c0_i32_1 = arith.constant 0 : i32
    return %c0_i32, %c0_i32_0 : i32, i32
  }
  func.func @transform_5(%arg0: i32) -> (i32, i32) {
    %c0_i32 = arith.constant 0 : i32
    %c0_i32_0 = arith.constant 0 : i32
    %c0_i32_1 = arith.constant 0 : i32
    return %c0_i32, %c0_i32_0 : i32, i32
  }
  func.func @transform_6(%arg0: i32) -> i32 {
    %c0_i32 = arith.constant 0 : i32
    %c0_i32_0 = arith.constant 0 : i32
    return %c0_i32 : i32
  }
  func.func @transform_7(%arg0: i32) -> (i32, i32) {
    %c0_i32 = arith.constant 0 : i32
    %c0_i32_0 = arith.constant 0 : i32
    return %arg0, %c0_i32 : i32, i32
  }
}

</mosaic_0001>

<bundles_post_ra>
// kernel: tpu_custom_call.1
= control target key start
LH: loop header
LB: loop body
LE: loop exit
PB: predicated region body
PF: predicated region fallthrough
CT: control target
= control target key end

     0   :  { %13 = vsyncpa [#allocation4], 0  ;;  %s847_s0 = inlined_call_operand.vmem [shape: f32[1,192], index: 0, kind: input, shape index: {}]   ;;  %s848_s1 = inlined_call_operand.vmem [shape: f32[1,64], index: 1, kind: input, shape index: {}]   ;;  %s849_s2 = inlined_call_operand.hbm [shape: f32[192,256], index: 2, kind: input, shape index: {}]   ;;  %s850_s3 = inlined_call_operand.vmem [shape: f32[64,256], index: 3, kind: input, shape index: {}]   ;;  %s851_s4 = inlined_call_operand.vmem [shape: f32[1,256], index: 4, kind: input, shape index: {}]   ;;  %s852_s5 = inlined_call_operand.vmem [shape: f32[256,8], index: 5, kind: input, shape index: {}]   ;;  %s853_s6 = inlined_call_operand.<no memory space> [shape: f32[1], index: 6, kind: input, shape index: {}]   ;;  %s854_s7 = inlined_call_operand.hbm [shape: f32[1,8], index: 7, kind: output, shape index: {}]  }
   0x1   :  { %14 = vsyncpa [#allocation5], 0  ;;  %s608_s24 = smov [#allocation3]   ;;  %s560_s28 = scalar_lea.hbm %s849_s2, 6144 }
   0x2   :  { %s24_s25 = sshll.u32 %s608_s24, 4  ;;  %p561_p0 = scmp.ne.s32.totalorder %s849_s2, %s560_s28  ;;  %s25_s25 = int_to_ptr.vmem [resolvable:$true] %s24_s25 }
   0x3   :  { %p564_p1 = scmp.lt.u32.totalorder %s560_s28, %s849_s2 }
   0x5   :  { %p566_p2 = pnand %p564_p1, %p561_p0 }
   0x7   :  { %569 = shalt.err (!%p566_p2)
}
   0x8   :  { %s570_s10 = scalar_lea.vmem %s25_s25, 6144  ;;  %p575_p4 = scmp.lt.s32.totalorder %s25_s25, %s25_s25 }
   0x9   :  { %p571_p3 = scmp.ne.s32.totalorder %s25_s25, %s570_s10  ;;  %p576_p5 = scmp.lt.s32.totalorder %s570_s10, %s570_s10 }
   0xb   :  { %p577_p6 = por %p576_p5, %p575_p4 }
   0xd   :  { %p578_p7 = pnand %p577_p6, %p571_p3 }
   0xf   :  { %581 = shalt.err (!%p578_p7)
}
  0x10   :  { %s609_s11 = smov 256   ;;  %s610_s12 = smov 16  }
  0x11   :  { %30 = dma.hbm_to_vmem [thread:$0]  %s849_s2, 6144, %s25_s25, [#allocation4], %s609_s11, %s609_s11, %s610_s12  }
  0x12   :  { %604 = dma.done.wait [#allocation4], 6144  }
  0x13   :  { %605 = vsyncadd [#allocation4], 4294961152  ;;  %v611_v0 = vmov 0.0   ;;  %v44_v1 = vld [vmem:[#allocation3 + $0x8] sm:$0xff]  ;;  %v46_v2 = vld [vmem:[#allocation3 + $0x18] sm:$0xff]  ;;  %v184_v27 = vlaneseq  ;;  %vm108_vm0 = vcmask 523264  }
  0x14   :  { %176 = vmatprep.mubr.f32.mxu1 %v611_v0  ;;  %v43_v3 = vld [vmem:[#allocation3] sm:$0xff]  ;;  %v469_v4 = vpack.c.bf16 %v46_v2, %v44_v1  ;;  %v45_v5 = vld [vmem:[#allocation3 + $0x10] sm:$0xff]  ;;  %v48_v6 = vld [vmem:[#allocation3 + $0x28] sm:$0xff]  ;;  %s612_s13 = smov [#allocation6]   ;;  %vm398_vm3 = vcmask 57344  }
  0x15   :  { %v50_v7 = vld [vmem:[#allocation3 + $0x38] sm:$0xff]  ;;  %v471_v8 = vpack.c.bf16 %v45_v5, %v43_v3  ;;  %v47_v10 = vld [vmem:[#allocation3 + $0x20] sm:$0xff]  ;;  %v49_v11 = vld [vmem:[#allocation3 + $0x30] sm:$0xff]  ;;  %v689_v44 = vshrl.u32 %v184_v27, 7  ;;  %s406_s14 = sshll.u32 %s612_s13, 4  ;;  %s407_s14 = int_to_ptr.vmem [resolvable:$true] %s406_s14 }
  0x16   :  { %v473_v9 = vpack.c.bf16 %v50_v7, %v48_v6  ;;  %v52_v12 = vld [vmem:[#allocation3 + $0x48] sm:$0xff]  ;;  %470 = vmatprep.subr.bf16.mxu0 %v469_v4  ;;  %v54_v13 = vld [vmem:[#allocation3 + $0x58] sm:$0xff]  ;;  %v475_v14 = vpack.c.bf16 %v49_v11, %v47_v10  ;;  %v51_v16 = vld [vmem:[#allocation3 + $0x40] sm:$0xff]  ;;  %s582_s2 = scalar_lea.vmem %s407_s14, 16  ;;  %s586_s15 = scalar_lea.vmem %s407_s14, 32 }
  0x17   :  { %472 = vmatpush1.bf16.msra.mxu0 %v471_v8  ;;  %v477_v15 = vpack.c.bf16 %v54_v13, %v52_v12  ;;  %v53_v17 = vld [vmem:[#allocation3 + $0x50] sm:$0xff]  ;;  %v56_v18 = vld [vmem:[#allocation3 + $0x68] sm:$0xff]  ;;  %v58_v19 = vld [vmem:[#allocation3 + $0x78] sm:$0xff]  ;;  %v190_v58 = vsub.s32 1, %v689_v44  ;;  %p583_p8 = scmp.ne.s32.totalorder %s407_s14, %s582_s2  ;;  %p587_p9 = scmp.lt.s32.totalorder %s407_s14, %s407_s14 }
  0x18   :  { %474 = vmatprep.subr.bf16.mxu0 %v473_v9  ;;  %v479_v20 = vpack.c.bf16 %v53_v17, %v51_v16  ;;  %v481_v21 = vpack.c.bf16 %v58_v19, %v56_v18  ;;  %v55_v22 = vld [vmem:[#allocation3 + $0x60] sm:$0xff]  ;;  %v57_v23 = vld [vmem:[#allocation3 + $0x70] sm:$0xff]  ;;  %v60_v24 = vld [vmem:[#allocation3 + $0x88] sm:$0xff]  ;;  %p588_p10 = scmp.lt.s32.totalorder %s586_s15, %s582_s2 }
  0x19   :  { %v62_v25 = vld [vmem:[#allocation3 + $0x98] sm:$0xff]  ;;  %v93_v26 = vld [vmem:[%s850_s3 + $0x8] sm:$0xff]  ;;  %v92_v29 = vld [vmem:[%s850_s3] sm:$0xff]  ;;  %v483_v31 = vpack.c.bf16 %v57_v23, %v55_v22 }
  0x1a   :  { %v95_v28 = vld [vmem:[%s850_s3 + $0x18] sm:$0xff]  ;;  %v94_v30 = vld [vmem:[%s850_s3 + $0x10] sm:$0xff]  ;;  %v59_v32 = vld [vmem:[#allocation3 + $0x80] sm:$0xff]  ;;  %v485_v36 = vpack.c.bf16 %v62_v25, %v60_v24  ;;  %p589_p11 = por %p588_p10, %p587_p9 }
  0x1b   :  { %476 = vmatpush1.bf16.msra.mxu0 %v475_v14  ;;  %v61_v33 = vld [vmem:[#allocation3 + $0x90] sm:$0xff]  ;;  %v453_v34 = vpack.c.bf16 %v95_v28, %v93_v26  ;;  %v455_v35 = vpack.c.bf16 %v94_v30, %v92_v29  ;;  %v64_v37 = vld [vmem:[#allocation3 + $0xa8] sm:$0xff]  ;;  %v99_v39 = vld [vmem:[%s850_s3 + $0x38] sm:$0xff] }
  0x1c   :  { %478 = vmatprep.subr.bf16.mxu0 %v477_v15  ;;  %v97_v38 = vld [vmem:[%s850_s3 + $0x28] sm:$0xff]  ;;  %v66_v40 = vld [vmem:[#allocation3 + $0xb8] sm:$0xff]  ;;  %v96_v42 = vld [vmem:[%s850_s3 + $0x20] sm:$0xff]  ;;  %v487_v46 = vpack.c.bf16 %v61_v33, %v59_v32  ;;  %p590_p12 = pnand %p589_p11, %p583_p8 }
  0x1d   :  { %454 = vmatprep.subr.bf16.mxu1 %v453_v34  ;;  %v457_v41 = vpack.c.bf16 %v99_v39, %v97_v38  ;;  %v98_v43 = vld [vmem:[%s850_s3 + $0x30] sm:$0xff]  ;;  %v101_v47 = vld [vmem:[%s850_s3 + $0x48] sm:$0xff]  ;;  %v103_v48 = vld [vmem:[%s850_s3 + $0x58] sm:$0xff]  ;;  %v489_v50 = vpack.c.bf16 %v66_v40, %v64_v37 }
  0x1e   :  { %456 = vmatpush1.bf16.msra.mxu1 %v455_v35  ;;  %v459_v45 = vpack.c.bf16 %v98_v43, %v96_v42  ;;  %v100_v49 = vld [vmem:[%s850_s3 + $0x40] sm:$0xff]  ;;  %v65_v52 = vld [vmem:[#allocation3 + $0xb0] sm:$0xff]  ;;  %v461_v53 = vpack.c.bf16 %v103_v48, %v101_v47  ;;  %v68_v55 = vld [vmem:[#allocation3 + $0xc8] sm:$0xff] }
  0x1f   :  { %480 = vmatpush1.bf16.msra.mxu0 %v479_v20  ;;  %458 = vmatprep.subr.bf16.mxu1 %v457_v41  ;;  %v63_v51 = vld [vmem:[#allocation3 + $0xa0] sm:$0xff]  ;;  %v102_v54 = vld [vmem:[%s850_s3 + $0x50] sm:$0xff]  ;;  %v70_v56 = vld [vmem:[#allocation3 + $0xd8] sm:$0xff] }
  0x20   :  { %482 = vmatprep.subr.bf16.mxu0 %v481_v21  ;;  %v105_v57 = vld [vmem:[%s850_s3 + $0x68] sm:$0xff]  ;;  %v463_v59 = vpack.c.bf16 %v102_v54, %v100_v49  ;;  %v107_v60 = vld [vmem:[%s850_s3 + $0x78] sm:$0xff]  ;;  %v491_v61 = vpack.c.bf16 %v65_v52, %v63_v51  ;;  %v67_v62 = vld [vmem:[#allocation3 + $0xc0] sm:$0xff]  ;;  %v493_v2 = vpack.c.bf16 %v70_v56, %v68_v55 }
  0x21   :  { %v465_v63 = vpack.c.bf16 %v107_v60, %v105_v57  ;;  %v104_v0 = vld [vmem:[%s850_s3 + $0x60] sm:$0xff]  ;;  %v106_v1 = vld [vmem:[%s850_s3 + $0x70] sm:$0xff]  ;;  %v72_v4 = vld [vmem:[#allocation3 + $0xe8] sm:$0xff] }
  0x22   :  { %460 = vmatpush1.bf16.msra.mxu1 %v459_v45  ;;  %v69_v3 = vld [vmem:[#allocation3 + $0xd0] sm:$0xff]  ;;  %v719_v5 = vld [vmem:[%s847_s0] sm:$0x3]  ;;  %v74_v6 = vld [vmem:[#allocation3 + $0xf8] sm:$0xff]  ;;  %v467_v10 = vpack.c.bf16 %v106_v1, %v104_v0 }
  0x23   :  { %484 = vmatpush1.bf16.msra.mxu0 %v483_v31  ;;  %462 = vmatprep.subr.bf16.mxu1 %v461_v53  ;;  %v191_v7 = vrot.slane %v719_v5, %v190_v58  ;;  %v302_v8 = vld [vmem:[%s852_s5 + $0x80] sm:$0xff]  ;;  %v303_v9 = vld [vmem:[%s852_s5 + $0x88] sm:$0xff]  ;;  %v495_v11 = vpack.c.bf16 %v69_v3, %v67_v62  ;;  %v497_v16 = vpack.c.bf16 %v74_v6, %v72_v4  ;;  %v73_v17 = vld [vmem:[#allocation3 + $0xf0] sm:$0xff] }
  0x24   :  { %486 = vmatprep.subr.bf16.mxu0 %v485_v36  ;;  %v71_v12 = vld [vmem:[#allocation3 + $0xe0] sm:$0xff]  ;;  %v517_v13 = vpack.c.bf16 %v303_v9, %v302_v8  ;;  %v287_v15 = vld [vmem:[%s852_s5 + $0x8] sm:$0xff]  ;;  %v304_v18 = vld [vmem:[%s852_s5 + $0x90] sm:$0xff]  ;;  %v186_v8 = vsub.s32 0, %v689_v44 }
  0x25   :  { %v286_v14 = vld [vmem:[%s852_s5] sm:$0xff]  ;;  %416 = vmatprep.mubr.msk.f32.mxu0 %vm108_vm0, %v191_v7  ;;  %v305_v19 = vld [vmem:[%s852_s5 + $0x98] sm:$0xff]  ;;  %v76_v20 = vld [vmem:[#allocation3 + $0x108] sm:$0xff]  ;;  %v499_v24 = vpack.c.bf16 %v73_v17, %v71_v12 }
  0x26   :  { %464 = vmatpush1.bf16.msra.mxu1 %v463_v59  ;;  %v78_v21 = vld [vmem:[#allocation3 + $0x118] sm:$0xff]  ;;  %v91_v22 = vld [vmem:[%s848_s1] sm:$0x1]  ;;  %v519_v23 = vpack.c.bf16 %v287_v15, %v286_v14  ;;  %v521_v26 = vpack.c.bf16 %v305_v19, %v304_v18  ;;  %v288_v27 = vld [vmem:[%s852_s5 + $0x10] sm:$0xff]  ;;  %v187_v12 = vrot.slane %v719_v5, %v186_v8 }
  0x27   :  { %488 = vmatpush1.bf16.msra.mxu0 %v487_v46  ;;  %466 = vmatprep.subr.bf16.mxu1 %v465_v63  ;;  %v75_v25 = vld [vmem:[#allocation3 + $0x100] sm:$0xff]  ;;  %v289_v28 = vld [vmem:[%s852_s5 + $0x18] sm:$0xff]  ;;  %v501_v29 = vpack.c.bf16 %v78_v21, %v76_v20  ;;  %v77_v30 = vld [vmem:[#allocation3 + $0x110] sm:$0xff] }
  0x28   :  { %490 = vmatprep.subr.bf16.mxu0 %v489_v50  ;;  %v306_v31 = vld [vmem:[%s852_s5 + $0xa0] sm:$0xff]  ;;  %v307_v32 = vld [vmem:[%s852_s5 + $0xa8] sm:$0xff]  ;;  %v82_v34 = vld [vmem:[#allocation3 + $0x138] sm:$0xff]  ;;  %v523_v35 = vpack.c.bf16 %v289_v28, %v288_v27  ;;  %v503_v36 = vpack.c.bf16 %v77_v30, %v75_v25 }
  0x29   :  { %v80_v33 = vld [vmem:[#allocation3 + $0x128] sm:$0xff]  ;;  %v79_v37 = vld [vmem:[#allocation3 + $0x120] sm:$0xff]  ;;  %v525_v38 = vpack.c.bf16 %v307_v32, %v306_v31  ;;  %v81_v42 = vld [vmem:[#allocation3 + $0x130] sm:$0xff] }
  0x2a   :  { %468 = vmatpush1.bf16.msra.mxu1 %v467_v10  ;;  %v290_v39 = vld [vmem:[%s852_s5 + $0x20] sm:$0xff]  ;;  %v291_v40 = vld [vmem:[%s852_s5 + $0x28] sm:$0xff]  ;;  %v505_v41 = vpack.c.bf16 %v82_v34, %v80_v33  ;;  %v308_v43 = vld [vmem:[%s852_s5 + $0xb0] sm:$0xff]  ;;  %v507_v49 = vpack.c.bf16 %v81_v42, %v79_v37 }
  0x2b   :  { %492 = vmatpush1.bf16.msra.mxu0 %v491_v61  ;;  %518 = vmatprep.subr.bf16.mxu1 %v517_v13  ;;  %v309_v45 = vld [vmem:[%s852_s5 + $0xb8] sm:$0xff]  ;;  %v84_v46 = vld [vmem:[#allocation3 + $0x148] sm:$0xff]  ;;  %v527_v48 = vpack.c.bf16 %v291_v40, %v290_v39  ;;  %v83_v50 = vld [vmem:[#allocation3 + $0x140] sm:$0xff] }
  0x2c   :  { %494 = vmatprep.subr.bf16.mxu0 %v493_v2  ;;  %v86_v47 = vld [vmem:[#allocation3 + $0x158] sm:$0xff]  ;;  %v529_v51 = vpack.c.bf16 %v309_v45, %v308_v43  ;;  %v292_v52 = vld [vmem:[%s852_s5 + $0x30] sm:$0xff]  ;;  %v310_v56 = vld [vmem:[%s852_s5 + $0xc0] sm:$0xff]  ;;  %v319_v43 = vstv %s853_s6 }
  0x2d   :  { %415 = vmatmul.mubr.msk.f32.vlgmr.msra.gmra.mrb[0].mxu1 %vm108_vm0, %v91_v22  ;;  %v293_v53 = vld [vmem:[%s852_s5 + $0x38] sm:$0xff]  ;;  %v509_v54 = vpack.c.bf16 %v86_v47, %v84_v46  ;;  %v85_v55 = vld [vmem:[#allocation3 + $0x150] sm:$0xff]  ;;  %v311_v57 = vld [vmem:[%s852_s5 + $0xc8] sm:$0xff] }
  0x2e   :  { %520 = vmatpush3.bf16.msra.mxu1 %v519_v23  ;;  %v88_v59 = vld [vmem:[#allocation3 + $0x168] sm:$0xff]  ;;  %v90_v60 = vld [vmem:[#allocation3 + $0x178] sm:$0xff]  ;;  %v531_v61 = vpack.c.bf16 %v293_v53, %v292_v52  ;;  %v511_v62 = vpack.c.bf16 %v85_v55, %v83_v50  ;;  %v87_v63 = vld [vmem:[#allocation3 + $0x160] sm:$0xff]  ;;  %v533_v0 = vpack.c.bf16 %v311_v57, %v310_v56 }
  0x2f   :  { %496 = vmatpush1.bf16.msra.mxu0 %v495_v11  ;;  %522 = vmatprep.subr.bf16.mxu1 %v521_v26  ;;  %v294_v1 = vld [vmem:[%s852_s5 + $0x40] sm:$0xff]  ;;  %v295_v2 = vld [vmem:[%s852_s5 + $0x48] sm:$0xff]  ;;  %v513_v3 = vpack.c.bf16 %v90_v60, %v88_v59  ;;  %v89_v4 = vld [vmem:[#allocation3 + $0x170] sm:$0xff] }
  0x30   :  { %498 = vmatprep.subr.bf16.mxu0 %v497_v16  ;;  %v312_v6 = vld [vmem:[%s852_s5 + $0xd0] sm:$0xff]  ;;  %v313_v7 = vld [vmem:[%s852_s5 + $0xd8] sm:$0xff]  ;;  %v535_v9 = vpack.c.bf16 %v295_v2, %v294_v1  ;;  %v515_v10 = vpack.c.bf16 %v89_v4, %v87_v63  ;;  %v314_v16 = vld [vmem:[%s852_s5 + $0xe0] sm:$0xff] }
  0x31   :  { %v537_v11 = vpack.c.bf16 %v313_v7, %v312_v6  ;;  %v296_v13 = vld [vmem:[%s852_s5 + $0x50] sm:$0xff]  ;;  %v297_v14 = vld [vmem:[%s852_s5 + $0x58] sm:$0xff]  ;;  %v315_v5 = vld [vmem:[%s852_s5 + $0xe8] sm:$0xff] }
  0x32   :  { %524 = vmatpush3.bf16.msra.mxu1 %v523_v35  ;;  %v539_v15 = vpack.c.bf16 %v297_v14, %v296_v13  ;;  %v541_v17 = vpack.c.bf16 %v315_v5, %v314_v16  ;;  %v298_v18 = vld [vmem:[%s852_s5 + $0x60] sm:$0xff]  ;;  %v299_v19 = vld [vmem:[%s852_s5 + $0x68] sm:$0xff]  ;;  %v316_v21 = vld [vmem:[%s852_s5 + $0xf0] sm:$0xff] }
  0x33   :  { %500 = vmatpush1.bf16.msra.mxu0 %v499_v24  ;;  %526 = vmatprep.subr.bf16.mxu1 %v525_v38  ;;  %v543_v20 = vpack.c.bf16 %v299_v19, %v298_v18  ;;  %v317_v22 = vld [vmem:[%s852_s5 + $0xf8] sm:$0xff]  ;;  %v300_v24 = vld [vmem:[%s852_s5 + $0x70] sm:$0xff] }
  0x34   :  { %502 = vmatprep.subr.bf16.mxu0 %v501_v29  ;;  %v545_v23 = vpack.c.bf16 %v317_v22, %v316_v21  ;;  %v301_v25 = vld [vmem:[%s852_s5 + $0x78] sm:$0xff]  ;;  %v266_v29 = vld [vmem:[%s851_s4] sm:$0x3] }
  0x35   :  { %v547_v26 = vpack.c.bf16 %v301_v25, %v300_v24  ;;  %v271_v30 = vrot.slane %v266_v29, %v186_v8  ;;  %v275_v32 = vrot.slane %v266_v29, %v190_v58 }
  0x36   :  { %528 = vmatpush3.bf16.msra.mxu1 %v527_v48 }
  0x37   :  { %504 = vmatpush1.bf16.msra.mxu0 %v503_v36  ;;  %530 = vmatprep.subr.bf16.mxu1 %v529_v51 }
  0x38   :  { %506 = vmatprep.subr.bf16.mxu0 %v505_v41 }
  0x3a   :  { %532 = vmatpush3.bf16.msra.mxu1 %v531_v61 }
  0x3b   :  { %508 = vmatpush1.bf16.msra.mxu0 %v507_v49  ;;  %534 = vmatprep.subr.bf16.mxu1 %v533_v0 }
  0x3c   :  { %510 = vmatprep.subr.bf16.mxu0 %v509_v54 }
  0x3e   :  { %536 = vmatpush3.bf16.msra.mxu1 %v535_v9 }
  0x3f   :  { %512 = vmatpush1.bf16.msra.mxu0 %v511_v62  ;;  %538 = vmatprep.subr.bf16.mxu1 %v537_v11 }
  0x40   :  { %514 = vmatprep.subr.bf16.mxu0 %v513_v3 }
  0x42   :  { %540 = vmatpush3.bf16.msra.mxu1 %v539_v15 }
  0x43   :  { %516 = vmatpush1.bf16.msra.mxu0 %v515_v10  ;;  %542 = vmatprep.subr.bf16.mxu1 %v541_v17 }
  0x46   :  { %260 = vmatmul.mubr.f32.vlgmr.msra.gmra.mrb[0].mxu0 %v187_v12  ;;  %544 = vmatpush3.bf16.msra.mxu1 %v543_v20 }
  0x47   :  { %546 = vmatprep.subr.bf16.mxu1 %v545_v23 }
  0x4a   :  { %548 = vmatpush3.bf16.msra.mxu1 %v547_v26 }
 0x100   :  { %v178_v27 = vpop.f32.mrb[0].mxu1 }
 0x101   :  { %v180_v28 = vpop.f32.mrb[1].mxu1 }
 0x119   :  { %v261_v31 = vpop.f32.mrb[0].mxu0 }
 0x11a   :  { %v262_v33 = vadd.f32 %v261_v31, %v178_v27  ;;  %v263_v34 = vpop.f32.mrb[1].mxu0 }
 0x11b   :  { %v264_v35 = vadd.f32 %v263_v34, %v180_v28 }
 0x11c   :  { %v278_v36 = vadd.f32 %v271_v30, %v262_v33 }
 0x11d   :  { %v279_v37 = vadd.f32 %v275_v32, %v264_v35 }
 0x11e   :  { %v282_v38 = vmul.f32 0.01, %v278_v36  ;;  %vm280_vm2 = vcmp.gt.f32.partialorder %v278_v36, 0.0 }
 0x11f   :  { %vm281_vm1 = vcmp.gt.f32.partialorder %v279_v37, 0.0  ;;  %v283_v39 = vmul.f32 0.01, %v279_v37 }
 0x120   :  { %v284_v41 = vsel %vm280_vm2, %v278_v36, %v282_v38 }
 0x121   :  { %v285_v40 = vsel %vm281_vm1, %v279_v37, %v283_v39 }
 0x122   :  { %384 = vmatprep.mubr.f32.mxu1 %v285_v40 }
 0x123   :  { %385 = vmatmul.mubr.f32.vlgmr.msra.gmra.mrb[2].mxu1 %v284_v41 }
 0x1f6   :  { %v450_v42 = vpop.f32.mrb[2].mxu1 }
 0x1f7   :  { %v451_v44 = vpop.f32.mrb[3].mxu1 }
 0x1f8   :  { %v452_v58 = vadd.f32 %v451_v44, %v450_v42 }
 0x1fa   :  { %v387_v45 = vadd.f32 %v452_v58, %v319_v43 }
 0x1fc   :  { %v417_v46 = vmul.f32 -1.442695, %v387_v45 }
 0x1fe   :  { %556 = vpow2.f32 %v417_v46 }
 0x208   :  { %v557_v47 = vpop.eup %556 }
 0x209   :  { %v393_v48 = vadd.f32 1.0, %v557_v47 }
 0x20b   :  { %558 = vrcp.f32 %v393_v48 }
 0x215   :  { %v559_v49 = vpop.eup %558 }
 0x216   :  { %v396_v50 = vmul.f32 2.0, %v559_v49 }
 0x218   :  { %v397_v51 = vadd.f32 -1.0, %v396_v50 }
 0x21a   :  { %399 = vst.msk [vmem:[#allocation6] sm:$0x1] %vm398_vm3, %v397_v51 }
 0x21b   :  { %593 = shalt.err (!%p590_p12)
}
 0x21c   :  { %s594_s17 = scalar_lea.hbm %s854_s7, 16 }
 0x21d   :  { %p595_p13 = scmp.ne.s32.totalorder %s854_s7, %s594_s17  ;;  %p598_p0 = scmp.lt.u32.totalorder %s594_s17, %s854_s7 }
 0x21f   :  { %p600_p1 = pnand %p598_p0, %p595_p13 }
 0x221   :  { %603 = shalt.err (!%p600_p1)
}
 0x222   :  { %409 = dma.vmem_to_hbm [thread:$0]  %s407_s14, 16, %s854_s7, [#allocation5]  }
 0x223   :  { %606 = dma.done.wait [#allocation5], 16  }
 0x224   :  { %607 = vsyncadd [#allocation5], 4294967280 }
 0x225   :  { %413 = vsyncpa [#allocation4], 1 }
 0x226   :  { %414 = vsyncpa [#allocation5], 1 }

</bundles_post_ra>
